<compile_context>
chip_gen: v7x
topology: tpu7x:2x2x1
jax: 0.10.0
libtpu: 0.0.40
codegen_flags: <defaults>
</compile_context>

<pallas_src>
import jax
import jax.numpy as jnp
from jax import lax
from jax.experimental import pallas as pl
from jax.experimental.pallas import tpu as pltpu


def _rtg_kernel(r_ref, rtg_ref):
    """rtg[b, k] = sum_{j >= T-1-k} rewards[b, j]  (cumsum of time-reversed rewards).

    Single MXU matmul against a constant anti-triangular mask built in-kernel:
        M[j, k] = 1.0 if j + k >= T-1 else 0.0
    so the time reversal and the suffix sum are both folded into one reduction --
    no reversed copy of the input is ever materialized in HBM, and the mask
    (T*T*4 bytes) lives only on-chip. precision=HIGHEST keeps full f32 accuracy
    (flops are negligible at these shapes and hidden under DMA on v5e/v6e).
    """
    _, t = r_ref.shape
    row = lax.broadcasted_iota(jnp.int32, (t, t), 0)   # j: time index of the input
    col = lax.broadcasted_iota(jnp.int32, (t, t), 1)   # k: output position
    mask = jnp.where(row + col >= t - 1, 1.0, 0.0).astype(jnp.float32)
    rtg_ref[...] = jnp.dot(
        r_ref[...], mask,
        preferred_element_type=jnp.float32,
        precision=jax.lax.Precision.HIGHEST,
    )


def load_data_compute(rewards: jax.Array, *, block_b: int | None = None,
                      dense_episode_infos: bool = False):
    """rewards: (B, T) float32.

    Returns (rtg (B,T) f32, episode_idxs, episode_lengths) matching
    LoadData.get_rtg / LoadData.get_episode_infos semantics (int32 instead of torch int64).
    episode_* are scalars by default (pure constants); set dense_episode_infos=True
    for dense (B,T) arrays like the torch reference.
    """
    B, T = rewards.shape
    rewards = rewards.astype(jnp.float32)

    # Lane-dense time axis: pad T up to a multiple of 128 only when necessary.
    # Front-padding with zeros keeps rtg_pad[:, :T] == rtg of the original problem.
    t_pad = max(128, pl.cdiv(T, 128) * 128)
    if t_pad != T:
        rewards = jnp.pad(rewards, ((0, 0), (t_pad - T, 0)))

    # Batch tile: multiple of 8, never larger than the array, capped at 512 rows and
    # ~4 MiB f32 per block; default targets >= 2 grid steps so both v7x cores get work.
    if block_b is None:
        target = pl.cdiv(pl.cdiv(B, 2), 8) * 8                       # ~B/2, rounded up to 8
        vmem_rows = max(8, (((4 * 1024 * 1024) // (t_pad * 4)) // 8) * 8)
        block_b = min(512, max(8, target), vmem_rows)
    if B < 8:
        tb = B                                                        # full-dim block (tiny batch)
    else:
        tb = max(8, min(block_b, (B // 8) * 8))                       # multiple of 8, <= B
    grid = (pl.cdiv(B, tb),)                                          # partial last block is masked

    rtg = pl.pallas_call(
        _rtg_kernel,
        out_shape=jax.ShapeDtypeStruct((B, t_pad), jnp.float32),
        grid=grid,
        in_specs=[pl.BlockSpec((tb, t_pad), lambda b: (b, 0))],
        out_specs=pl.BlockSpec((tb, t_pad), lambda b: (b, 0)),
        compiler_params=pltpu.CompilerParams(
            dimension_semantics=("parallel",),           # megacore-shardable batch axis
            vmem_limit_bytes=48 * 1024 * 1024,           # headroom for large tb*T, < v7x 64 MiB
        ),
        cost_estimate=pl.CostEstimate(
            flops=2 * B * t_pad * t_pad,
            transcendentals=0,
            bytes_accessed=2 * B * t_pad * 4,
        ),
    )(rewards)

    if t_pad != T:
        rtg = rtg[:, :T]

    # get_episode_infos: pure compile-time constants. By default return scalars
    # (no B*T*4 bytes of HBM writeback each); densify only if a consumer needs it.
    if dense_episode_infos:
        episode_idxs = jnp.full((B, T), T - 1, dtype=jnp.int32)
        episode_lengths = jnp.full((B, T), T, dtype=jnp.int32)
    else:
        episode_idxs = jnp.int32(T - 1)
        episode_lengths = jnp.int32(T)
    return rtg, episode_idxs, episode_lengths


if __name__ == "__main__":
    key = jax.random.PRNGKey(0)
    B, T = 16, 128                       # small batch of episodes, lane-dense T
    rewards = jax.random.uniform(key, (B, T), dtype=jnp.float32)

    rtg, episode_idxs, episode_lengths = load_data_compute(
        rewards, dense_episode_infos=True)
    jax.block_until_ready((rtg, episode_idxs, episode_lengths))

    # Pure-JAX reference of LoadData.get_rtg / get_episode_infos semantics.
    rtg_ref = jnp.cumsum(rewards[:, ::-1], axis=1)
    idx_ref = jnp.full((B, T), T - 1, dtype=jnp.int32)
    len_ref = jnp.full((B, T), T, dtype=jnp.int32)

    assert jnp.allclose(rtg, rtg_ref, atol=1e-3, rtol=1e-5)
    assert jnp.array_equal(episode_idxs, idx_ref)
    assert jnp.array_equal(episode_lengths, len_ref)

    print("KERNEL_OK")
</pallas_src>

<mosaic_0001>
module attributes {stable_mosaic.version = 11 : i64} {
  func.func @_rtg_kernel(%arg0: i32, %arg1: memref<8x128xf32, #tpu.memory_space<vmem>>, %arg2: memref<8x128xf32, #tpu.memory_space<vmem>>) attributes {dimension_semantics = [#tpu.dimension_semantics<parallel>], iteration_bounds = array<i64: 2>, scalar_prefetch = 0 : i64, scratch_operands = 0 : i64, tpu.core_type = #tpu.core_type<tc>, window_params = [{transform_indices = @transform_0, window_bounds = array<i64: 8, 128>}, {transform_indices = @transform_1, window_bounds = array<i64: 8, 128>}]} {
    %0 = tpu.iota {dimensions = array<i32: 0>} : vector<128x128xi32>
    %1 = tpu.iota {dimensions = array<i32: 1>} : vector<128x128xi32>
    %2 = arith.addi %0, %1 : vector<128x128xi32>
    %c127_i32 = arith.constant 127 : i32
    %3 = vector.broadcast %c127_i32 : i32 to vector<128x128xi32>
    %4 = arith.cmpi sge, %2, %3 : vector<128x128xi32>
    %cst = arith.constant 1.000000e+00 : f32
    %cst_0 = arith.constant 0.000000e+00 : f32
    %5 = vector.broadcast %cst : f32 to vector<128x128xf32>
    %6 = vector.broadcast %cst_0 : f32 to vector<128x128xf32>
    %7 = arith.select %4, %5, %6 : vector<128x128xi1>, vector<128x128xf32>
    %c0 = arith.constant 0 : index
    %c0_1 = arith.constant 0 : index
    %8 = vector.load %arg1[%c0, %c0_1] : memref<8x128xf32, #tpu.memory_space<vmem>>, vector<8x128xf32>
    %cst_2 = arith.constant dense<0.000000e+00> : vector<8x128xf32>
    %9 = tpu.matmul %8, %7, %cst_2 {dimension_numbers = #tpu.dot_dimension_numbers<[1], [0], [0], [1], [0, 0, 1, 1], [], []>, precision = #tpu.contract_precision<fp32>} : vector<8x128xf32>, vector<128x128xf32>, vector<8x128xf32> -> vector<8x128xf32>
    %c0_3 = arith.constant 0 : index
    %c0_4 = arith.constant 0 : index
    %10 = vector.load %arg2[%c0_3, %c0_4] : memref<8x128xf32, #tpu.memory_space<vmem>>, vector<8x128xf32>
    tpu.vector_store %arg2[%c0_3, %c0_4], %9 {strides = array<i32>} : memref<8x128xf32, #tpu.memory_space<vmem>>, vector<8x128xf32>,
    return
  }
  func.func @transform_0(%arg0: i32) -> (i32, i32) {
    %c0_i32 = arith.constant 0 : i32
    %c0_i32_0 = arith.constant 0 : i32
    return %arg0, %c0_i32 : i32, i32
  }
  func.func @transform_1(%arg0: i32) -> (i32, i32) {
    %c0_i32 = arith.constant 0 : i32
    %c0_i32_0 = arith.constant 0 : i32
    return %arg0, %c0_i32 : i32, i32
  }
}

</mosaic_0001>

<bundles_post_ra>
// kernel: tpu_custom_call.1
= control target key start
LH: loop header
LB: loop body
LE: loop exit
PB: predicated region body
PF: predicated region fallthrough
CT: control target
= control target key end

     0   :  { %6 = vsyncpa [#allocation3], 0  ;;  %s2080_s0 = inlined_call_operand.hbm [shape: f32[16,128], index: 0, kind: input, shape index: {}]   ;;  %s2081_s1 = inlined_call_operand.hbm [shape: f32[16,128], index: 1, kind: output, shape index: {}]  }
   0x1   :  { %8 = vsyncpa [#allocation3 + $0x1], 0 }
   0x2   :  { %9 = vsyncpa [#allocation4], 0 }
   0x3   :  { %11 = vsyncpa [#allocation4 + $0x1], 0  ;;  %s1519_s6 = smov 0   ;;  %s1521_s7 = smov 0  }
   0x4   :  { %s1523_s8 = smov 0   ;;  %s1525_s9 = smov 0  }
   0x5 LB: > { %s1540_s10 = sadd.s32 4294967295, %s1501_s9   ;;  %s830_s11 = sadd.s32 4294967294, %s1501_s9   ;;  %s1501_s9 = sphi %s1525_s9, %s2112_s9   ;;  %s1497_s8 = sphi %s1523_s8, %s2111_s8   ;;  %s1493_s7 = sphi %s1521_s7, %s2110_s7   ;;  %s1489_s6 = sphi %s1519_s6, %s2109_s6  }
   0x6   : > { %s1544_s12 = sadd.s32 1, %s1501_s9   ;;  %s24_s13 = sadd.s32 1, %s1497_s8 }
   0x7   : > { %s21_s14 = ssub.s32 %s1501_s9, %s1544_s12  ;;  %p31_p0 = scmp.ne.s32.totalorder %s1497_s8, %s1493_s7 }
   0x8   : > { %p22_p1 = scmp.eq.s32.totalorder %s21_s14, 0  ;;  %p32_p2 = scmp.eq.s32.totalorder %s1501_s9, 0 }
   0x9   : > { %p37_p3 = scmp.ne.s32.totalorder %s1493_s7, %s1489_s6  ;;  %p38_p4 = scmp.eq.s32.totalorder %s1540_s10, 0 }
   0xa   : > { %s1556_s15 = scalar_select %p22_p1, %s1497_s8, %s24_s13  }
   0xb   : > { %p1558_p5 = por %p32_p2, %p31_p0  ;;  %p1562_p6 = por %p38_p4, %p37_p3 }
   0xc   : > { %p61_p7 = scmp.eq.s32.totalorder %s1540_s10, 1  ;;  %p67_p8 = scmp.eq.s32.totalorder %s830_s11, 1 }
   0xd   : > { %p1367_p10 = scmp.lt.s32.totalorder %s1501_s9, 2  ;;  %s87_s20 = sand.u32 1, %s1497_s8  }
   0xe   : > { %p1569_p11 = por %p61_p7, %p31_p0  ;;  %p1573_p12 = por %p67_p8, %p37_p3 }
   0xf   : > { %s834_s21 = sshll.u32 %s1501_s9, 7  ;;  %s833_s22 = sshll.u32 %s87_s20, 3 }
  0x10   : > { %s2085_s18 = scalar_select %p1569_p11, 1, 0 }
  0x11   : > { %s2086_s19 = scalar_select %p1573_p12, 1, 0 }
  0x12   : > { %s1582_s25 = scalar_lea.hbm %s2080_s0, %s834_s21  ;;  %s91_s26 = scalar_lea.vmem [#allocation2], %s833_s22 }
  0x13   : > { %s98_s27 = sshll.u32 %s91_s26, 4  ;;  %p1586_p13 = pnand %p1367_p10, %p1558_p5  ;;  %s1590_s27 = int_to_ptr.vmem [resolvable:$true] %s98_s27 }
  0x14   : > { %s88_s29 = scalar_lea.sflag [#allocation3], %s87_s20  ;;  %s1405_s30 = scalar_lea.hbm %s1582_s25, 128 }
  0x15   : > { %p1406_p2 = scmp.ne.s32.totalorder %s1582_s25, %s1405_s30  ;;  %p1407_p3 = pneg %p1586_p13 }
  0x16   : > { %s1410_s4 = scalar_lea.hbm %s2080_s0, 256  ;;  %p1411_p5 = scmp.lt.u32.totalorder %s1582_s25, %s2080_s0 }
  0x17   : > { %p1408_p4 = pnand %p1407_p3, %p1406_p2  ;;  %p1412_p8 = scmp.lt.u32.totalorder %s1410_s4, %s1405_s30 }
  0x18   : > { %p1414_p9 = scmp.lt.u32.totalorder %s1405_s30, %s1582_s25 }
  0x19   : > { %p1409_p7 = pneg %p1408_p4  ;;  %p1413_p10 = por %p1412_p8, %p1411_p5 }
  0x1b   : > { %p1415_p0 = por %p1414_p9, %p1413_p10 }
  0x1d   : > { %p1416_p1 = pnand %p1415_p0, %p1409_p7 }
  0x1f   : > { %1419 = shalt.err (!%p1416_p1)
}
  0x20   : > { %s1420_s13 = scalar_lea.vmem %s1590_s27, 128  ;;  %s1503_s14 = smov [#allocation2]  }
  0x21   : > { %p1421_p2 = scmp.ne.s32.totalorder %s1590_s27, %s1420_s13  ;;  %s1425_s16 = sshll.u32 %s1503_s14, 4  ;;  %s1426_s16 = int_to_ptr.vmem [resolvable:$false] %s1425_s16 }
  0x22   : > { %s1427_s20 = scalar_lea.vmem %s1426_s16, 256  ;;  %p1428_p11 = scmp.lt.s32.totalorder %s1590_s27, %s1426_s16 }
  0x23   : > { %p1423_p4 = pnand %p1421_p2, %p1407_p3  ;;  %p1429_p5 = scmp.lt.s32.totalorder %s1427_s20, %s1420_s13 }
  0x25   : > { %p1424_p12 = pneg %p1423_p4  ;;  %p1430_p8 = por %p1429_p5, %p1428_p11 }
  0x27   : > { %p1431_p9 = pnand %p1430_p8, %p1424_p12 }
  0x29   : > { %1434 = shalt.err (!%p1431_p9)
}
  0x2a   : > { %1362 = dma.hbm_to_vmem [thread:$0]  (!%p1586_p13), %s1582_s25, 128, %s1590_s27, %s88_s29  }
  0x2b   : > { %p2088_p0 = scmp.lt.s32.totalorder %s1501_s9, 3  ;;  %p2089_p1 = scmp.ge.s32.totalorder %s1501_s9, 1 }
  0x2d   : > { %p104_p3 = pnand %p2089_p1, %p2088_p0 }
  0x2e   : > { %s1624_s21 = sand.u32 (!%p104_p3), 1, %s1493_s7   ;;  %v132_v0 = vlaneseq (!%p104_p3) }
  0x2f   : > { %107 = sbr.rel (%p104_p3) target bundleno = 386 (0x182), region = 24  ;;  %s836_s22 = sshll.u32 (!%p104_p3), %s1624_s21, 3 }
  0x30   : > { %s110_s23 = scalar_lea.sflag (!%p104_p3), [#allocation3], %s1624_s21  ;;  %s1630_s24 = scalar_lea.vmem (!%p104_p3), [#allocation2], %s836_s22 }
  0x36   : > { %1480 = dma.done.wait (%p1562_p6), %s110_s23, 128  }
  0x37   : > { %1482 = vsyncadd (%p1562_p6), %s110_s23, 4294967168  ;;  %v1504_v1 = vmov 0.0|0.0   ;;  %v1638_v2 = vshrl.u32 %v132_v0, 7  ;;  %v1640_v3 = vand.u32 127, %v132_v0  ;;  %vm1505_vm0 = vmmov 0   ;;  %v199_v46 = vld [vmem:[%s1630_s24] sm:$0xff] }
  0x38   : > { %1202 = vmatprep.subr.bf16.mxu1 %v1504_v1  ;;  %1274 = vmatprep.subr.bf16.mxu0 %v1504_v1  ;;  %v1506_v4 = vmov 0.0   ;;  %v1507_v19 = vmov 1.0|1.0   ;;  %v1794_v53 = vand.u32 4294901760, %v199_v46  ;;  %s887_s17 = sshll.u32 %s1540_s10, 7  ;;  %s131_s25 = scalar_lea.vmem [#allocation5], %s836_s22 }
  0x39   : > { %1024 = vmatprep.mubr.msk.f32.mxu1 %vm1505_vm0, %v1506_v4  ;;  %1129 = vmatprep.mubr.msk.f32.mxu0 %vm1505_vm0, %v1506_v4  ;;  %v134_v5 = vadd.s32 8, %v1638_v2  ;;  %v151_v6 = vadd.s32 %v1640_v3, %v1638_v2  ;;  %v135_v7 = vadd.s32 16, %v1638_v2  ;;  %v136_v8 = vadd.s32 24, %v1638_v2  ;;  %s760_s26 = sshll.u32 %s131_s25, 4  ;;  %s2036_s29 = scalar_lea.hbm %s2081_s1, %s887_s17  ;;  %s2038_s26 = int_to_ptr.vmem [resolvable:$true] %s760_s26 }
  0x3a   : > { %v137_v9 = vadd.s32 32, %v1638_v2  ;;  %v138_v10 = vadd.s32 40, %v1638_v2  ;;  %v139_v15 = vadd.s32 48, %v1638_v2  ;;  %v140_v16 = vadd.s32 56, %v1638_v2  ;;  %s747_s10 = scalar_lea.sflag [#allocation4], %s1624_s21  ;;  %s1435_s30 = scalar_lea.vmem %s2038_s26, 128 }
  0x3b   : > { %v152_v11 = vadd.s32 %v1640_v3, %v134_v5  ;;  %vm167_vm1 = vcmp.ge.s32.totalorder %v151_v6, 127  ;;  %v153_v12 = vadd.s32 %v1640_v3, %v135_v7  ;;  %v154_v13 = vadd.s32 %v1640_v3, %v136_v8  ;;  %p1436_p6 = scmp.ne.s32.totalorder %s2038_s26, %s1435_s30  ;;  %p2106_p11 = scmp.ne.s32.totalorder %s2085_s18, 0 }
  0x3c   : > { %v155_v14 = vadd.s32 %v1640_v3, %v137_v9  ;;  %v1660_v17 = vadd.s32 %v1640_v3, %v138_v10  ;;  %v157_v21 = vadd.s32 %v1640_v3, %v139_v15  ;;  %v1685_v22 = vadd.s32 %v1640_v3, %v140_v16  ;;  %s1508_s2 = smov [#allocation5]  }
  0x3d   : > { %vm168_vm2 = vcmp.ge.s32.totalorder %v152_v11, 127  ;;  %vm169_vm3 = vcmp.ge.s32.totalorder %v153_v12, 127  ;;  %vm170_vm4 = vcmp.ge.s32.totalorder %v154_v13, 127  ;;  %v183_v23 = vsel %vm167_vm1, 1.0, %v1506_v4  ;;  %p1437_p12 = pnand %p1436_p6, %p2106_p11  ;;  %s1439_s3 = sshll.u32 %s1508_s2, 4  ;;  %s1440_s3 = int_to_ptr.vmem [resolvable:$false] %s1439_s3 }
  0x3e   : > { %vm1664_vm5 = vmpackc.low %vm168_vm2, %vm167_vm1  ;;  %vm171_vm7 = vcmp.ge.s32.totalorder %v155_v14, 127  ;;  %vm172_vm8 = vcmp.ge.s32.totalorder %v1660_v17, 127  ;;  %v141_v25 = vadd.s32 64, %v1638_v2  ;;  %vm173_vm10 = vcmp.ge.s32.totalorder %v157_v21, 127  ;;  %s1441_s4 = scalar_lea.vmem %s1440_s3, 256  ;;  %p1442_p7 = scmp.lt.s32.totalorder %s2038_s26, %s1440_s3 }
  0x3f   : > { %1204 = vmatpush3.bf16.msk.msra.mxu1 %vm1664_vm5, %v1507_v19  ;;  %1276 = vmatpush3.bf16.msk.msra.mxu0 %vm1664_vm5, %v1507_v19  ;;  %vm1678_vm6 = vmpackc.low %vm170_vm4, %vm169_vm3  ;;  %vm174_vm11 = vcmp.ge.s32.totalorder %v1685_v22, 127  ;;  %v142_v26 = vadd.s32 72, %v1638_v2  ;;  %v143_v27 = vadd.s32 80, %v1638_v2  ;;  %v144_v29 = vadd.s32 88, %v1638_v2  ;;  %p1438_p13 = pneg %p1437_p12  ;;  %p1443_p10 = scmp.lt.s32.totalorder %s1441_s4, %s1435_s30 }
  0x40   : > { %1205 = vmatprep.subr.bf16.mxu1 %v1504_v1  ;;  %1277 = vmatprep.subr.bf16.mxu0 %v1504_v1  ;;  %vm1700_vm9 = vmpackc.low %vm172_vm8, %vm171_vm7  ;;  %v1709_v28 = vadd.s32 %v1640_v3, %v141_v25  ;;  %v184_v30 = vsel %vm168_vm2, 1.0, %v1506_v4  ;;  %v1714_v31 = vsub.f32 %v183_v23, %v183_v23  ;;  %v145_v35 = vadd.s32 96, %v1638_v2 }
  0x41   : > { %v1723_v32 = vadd.s32 %v1640_v3, %v142_v26  ;;  %vm1730_vm12 = vmpackc.low %vm174_vm11, %vm173_vm10  ;;  %v1735_v34 = vadd.s32 %v1640_v3, %v143_v27  ;;  %v1741_v36 = vadd.s32 %v1640_v3, %v144_v29  ;;  %v146_v37 = vadd.s32 104, %v1638_v2  ;;  %p1444_p2 = por %p1443_p10, %p1442_p7 }
  0x42   : > { %vm175_vm13 = vcmp.ge.s32.totalorder %v1709_v28, 127  ;;  %v1744_v38 = vsub.f32 %v184_v30, %v184_v30  ;;  %v277_v39 = vand.u32 4294901760, %v1714_v31  ;;  %v185_v40 = vsel %vm169_vm3, 1.0, %v1506_v4 }
  0x43   : > { %1207 = vmatpush3.bf16.msk.msra.mxu1 %vm1678_vm6, %v1507_v19  ;;  %1279 = vmatpush3.bf16.msk.msra.mxu0 %vm1678_vm6, %v1507_v19  ;;  %vm176_vm14 = vcmp.ge.s32.totalorder %v1723_v32, 127  ;;  %v186_v41 = vsel %vm170_vm4, 1.0, %v1506_v4  ;;  %v187_v42 = vsel %vm171_vm7, 1.0, %v1506_v4  ;;  %v1770_v44 = vadd.s32 %v1640_v3, %v145_v35  ;;  %p1445_p4 = pnand %p1444_p2, %p1438_p13 }
  0x44   : > { %1208 = vmatprep.subr.bf16.mxu1 %v1504_v1  ;;  %1280 = vmatprep.subr.bf16.mxu0 %v1504_v1  ;;  %vm1765_vm15 = vmpackc.low %vm176_vm14, %vm175_vm13  ;;  %v147_v45 = vadd.s32 112, %v1638_v2  ;;  %vm177_vm1 = vcmp.ge.s32.totalorder %v1735_v34, 127  ;;  %vm178_vm2 = vcmp.ge.s32.totalorder %v1741_v36, 127  ;;  %v1777_v47 = vadd.s32 %v1640_v3, %v146_v37 }
  0x45   : > { %v148_v48 = vadd.s32 120, %v1638_v2  ;;  %v283_v49 = vand.u32 4294901760, %v1744_v38  ;;  %v278_v50 = vsub.f32 %v1714_v31, %v277_v39  ;;  %v1784_v51 = vsub.f32 %v185_v40, %v185_v40  ;;  %vm1809_vm3 = vmpackc.low %vm178_vm2, %vm177_vm1 }
  0x46   : > { %v1786_v52 = vsub.f32 %v186_v41, %v186_v41  ;;  %v188_v54 = vsel %vm172_vm8, 1.0, %v1506_v4  ;;  %v1799_v55 = vsub.f32 %v187_v42, %v187_v42  ;;  %v189_v56 = vsel %vm173_vm10, 1.0, %v1506_v4 }
  0x47   : > { %1210 = vmatpush3.bf16.msk.msra.mxu1 %vm1700_vm9, %v1507_v19  ;;  %1282 = vmatpush3.bf16.msk.msra.mxu0 %vm1700_vm9, %v1507_v19  ;;  %vm179_vm4 = vcmp.ge.s32.totalorder %v1770_v44, 127  ;;  %vm180_vm7 = vcmp.ge.s32.totalorder %v1777_v47, 127  ;;  %v1816_v58 = vadd.s32 %v1640_v3, %v147_v45  ;;  %v1819_v59 = vadd.s32 %v1640_v3, %v148_v48 }
  0x48   : > { %1211 = vmatprep.subr.bf16.mxu1 %v1504_v1  ;;  %1283 = vmatprep.subr.bf16.mxu0 %v1504_v1  ;;  %v1822_v60 = vsub.f32 %v199_v46, %v1794_v53  ;;  %v284_v61 = vsub.f32 %v1744_v38, %v283_v49  ;;  %v190_v62 = vsel %vm174_vm11, 1.0, %v1506_v4  ;;  %v289_v63 = vand.u32 4294901760, %v1784_v51  ;;  %vm1847_vm8 = vmpackc.low %vm180_vm7, %vm179_vm4 }
  0x49   : > { %v295_v0 = vand.u32 4294901760, %v1786_v52  ;;  %v1830_v2 = vsub.f32 %v188_v54, %v188_v54  ;;  %v279_v5 = vand.u32 4294901760, %v278_v50  ;;  %v1839_v6 = vsub.f32 %v189_v56, %v189_v56 }
  0x4a   : > { %v267_v3 = vand.u32 4294901760, %v1822_v60  ;;  %v301_v8 = vand.u32 4294901760, %v1799_v55  ;;  %v1852_v9 = vsub.f32 %v190_v62, %v190_v62  ;;  %vm181_vm10 = vcmp.ge.s32.totalorder %v1816_v58, 127 }
  0x4b   : > { %1213 = vmatpush3.bf16.msk.msra.mxu1 %vm1730_vm12, %v1507_v19  ;;  %1285 = vmatpush3.bf16.msk.msra.mxu0 %vm1730_vm12, %v1507_v19  ;;  %vm182_vm11 = vcmp.ge.s32.totalorder %v1819_v59, 127  ;;  %v285_v10 = vand.u32 4294901760, %v284_v61  ;;  %v191_v11 = vsel %vm175_vm13, 1.0, %v1506_v4  ;;  %v192_v12 = vsel %vm176_vm14, 1.0, %v1506_v4 }
  0x4c   : > { %1214 = vmatprep.subr.bf16.mxu1 %v1504_v1  ;;  %1286 = vmatprep.subr.bf16.mxu0 %v1504_v1  ;;  %v268_v13 = vsub.f32 %v1822_v60, %v267_v3  ;;  %v307_v14 = vand.u32 4294901760, %v1830_v2  ;;  %v290_v15 = vsub.f32 %v1784_v51, %v289_v63  ;;  %v296_v16 = vsub.f32 %v1786_v52, %v295_v0  ;;  %vm1879_vm13 = vmpackc.low %vm182_vm11, %vm181_vm10 }
  0x4d   : > { %v313_v17 = vand.u32 4294901760, %v1839_v6  ;;  %v319_v22 = vand.u32 4294901760, %v1852_v9  ;;  %v1884_v23 = vsub.f32 %v191_v11, %v191_v11  ;;  %v1886_v25 = vsub.f32 %v192_v12, %v192_v12 }
  0x4e   : > { %v193_v26 = vsel %vm177_vm1, 1.0, %v1506_v4  ;;  %v194_v27 = vsel %vm178_vm2, 1.0, %v1506_v4  ;;  %v269_v28 = vand.u32 4294901760, %v268_v13  ;;  %v1227_v29 = vpack.c.bf16 %v285_v10, %v279_v5 }
  0x4f   : > { %1216 = vmatpush3.bf16.msk.msra.mxu1 %vm1765_vm15, %v1507_v19  ;;  %1288 = vmatpush3.bf16.msk.msra.mxu0 %vm1765_vm15, %v1507_v19  ;;  %v302_v30 = vsub.f32 %v1799_v55, %v301_v8  ;;  %v1299_v32 = vpack.c.bf16 %v283_v49, %v277_v39  ;;  %v291_v34 = vand.u32 4294901760, %v290_v15  ;;  %v297_v35 = vand.u32 4294901760, %v296_v16 }
  0x50   : > { %1217 = vmatprep.subr.bf16.mxu1 %v1504_v1  ;;  %1289 = vmatprep.subr.bf16.mxu0 %v1504_v1  ;;  %v308_v36 = vsub.f32 %v1830_v2, %v307_v14  ;;  %v325_v37 = vand.u32 4294901760, %v1884_v23  ;;  %v331_v40 = vand.u32 4294901760, %v1886_v25  ;;  %v1908_v41 = vsub.f32 %v193_v26, %v193_v26 }
  0x51   : > { %v1910_v42 = vsub.f32 %v194_v27, %v194_v27  ;;  %v195_v39 = vsel %vm179_vm4, 1.0, %v1506_v4  ;;  %v196_v45 = vsel %vm180_vm7, 1.0, %v1506_v4  ;;  %v1302_v46 = vpack.c.bf16 %v295_v0, %v289_v63 }
  0x52   : > { %v303_v48 = vand.u32 4294901760, %v302_v30  ;;  %v1230_v49 = vpack.c.bf16 %v297_v35, %v291_v34  ;;  %v309_v50 = vand.u32 4294901760, %v308_v36  ;;  %v314_v54 = vsub.f32 %v1839_v6, %v313_v17 }
  0x53   : > { %1219 = vmatpush3.bf16.msk.msra.mxu1 %vm1809_vm3, %v1507_v19  ;;  %1291 = vmatpush3.bf16.msk.msra.mxu0 %vm1809_vm3, %v1507_v19  ;;  %v320_v56 = vsub.f32 %v1852_v9, %v319_v22  ;;  %v337_v44 = vand.u32 4294901760, %v1908_v41  ;;  %v343_v47 = vand.u32 4294901760, %v1910_v42  ;;  %v1924_v61 = vsub.f32 %v195_v39, %v195_v39 }
  0x54   : > { %1220 = vmatprep.subr.bf16.mxu1 %v1504_v1  ;;  %1292 = vmatprep.subr.bf16.mxu0 %v1504_v1  ;;  %v1926_v62 = vsub.f32 %v196_v45, %v196_v45  ;;  %v197_v63 = vsel %vm181_vm10, 1.0, %v1506_v4  ;;  %v198_v0 = vsel %vm182_vm11, 1.0, %v1506_v4  ;;  %v326_v5 = vsub.f32 %v1884_v23, %v325_v37 }
  0x55   : > { %v1233_v10 = vpack.c.bf16 %v309_v50, %v303_v48  ;;  %v315_v11 = vand.u32 4294901760, %v314_v54  ;;  %v321_v12 = vand.u32 4294901760, %v320_v56  ;;  %v332_v13 = vsub.f32 %v1886_v25, %v331_v40 }
  0x56   : > { %v349_v58 = vand.u32 4294901760, %v1924_v61  ;;  %v355_v15 = vand.u32 4294901760, %v1926_v62  ;;  %v1944_v59 = vsub.f32 %v197_v63, %v197_v63  ;;  %v327_v16 = vand.u32 4294901760, %v326_v5 }
  0x57   : > { %1222 = vmatpush3.bf16.msk.msra.mxu1 %vm1847_vm8, %v1507_v19  ;;  %1294 = vmatpush3.bf16.msk.msra.mxu0 %vm1847_vm8, %v1507_v19  ;;  %v1236_v26 = vpack.c.bf16 %v321_v12, %v315_v11  ;;  %v333_v27 = vand.u32 4294901760, %v332_v13  ;;  %v1311_v34 = vpack.c.bf16 %v331_v40, %v325_v37  ;;  %v1314_v45 = vpack.c.bf16 %v343_v47, %v337_v44 }
  0x58   : > { %1223 = vmatprep.subr.bf16.mxu1 %v1504_v1  ;;  %1295 = vmatprep.subr.bf16.mxu0 %v1504_v1  ;;  %v361_v30 = vand.u32 4294901760, %v1944_v59  ;;  %v356_v39 = vsub.f32 %v1926_v62, %v355_v15  ;;  %v1317_v54 = vpack.c.bf16 %v355_v15, %v349_v58  ;;  %v1257_v18 = vpack.c.bf16 %v1830_v2, %v1799_v55 }
  0x59   : > { %v1263_v20 = vpack.c.bf16 %v1886_v25, %v1884_v23  ;;  %v1266_v24 = vpack.c.bf16 %v1910_v42, %v1908_v41 }
  0x5a   : > { %v362_v37 = vsub.f32 %v1944_v59, %v361_v30 }
  0x5b   : > { %1225 = vmatpush3.bf16.msk.msra.mxu1 %vm1879_vm13, %v1507_v19  ;;  %1297 = vmatpush3.bf16.msk.msra.mxu0 %vm1879_vm13, %v1507_v19 }
  0x5c   : > { %1226 = vmatprep.subr.bf16.mxu1 %v1504_v1  ;;  %1298 = vmatprep.subr.bf16.mxu0 %v1504_v1  ;;  %v363_v56 = vand.u32 4294901760, %v362_v37 }
  0x5e   : > { %1025 = vmatmul.mubr.f32.vlgmr.msra.gmra.mrb[0].mxu1 %v269_v28  ;;  %1130 = vmatmul.mubr.f32.vlgmr.msra.gmra.mrb[0].mxu0 %v267_v3  ;;  %v1305_v3 = vpack.c.bf16 %v307_v14, %v301_v8  ;;  %v1946_v8 = vsub.f32 %v198_v0, %v198_v0  ;;  %v1308_v14 = vpack.c.bf16 %v319_v22, %v313_v17 }
  0x5f   : > { %1228 = vmatpush3.bf16.msra.mxu1 %v1227_v29  ;;  %1300 = vmatpush3.bf16.msra.mxu0 %v1299_v32  ;;  %v338_v28 = vsub.f32 %v1908_v41, %v337_v44  ;;  %v344_v29 = vsub.f32 %v1910_v42, %v343_v47  ;;  %v350_v17 = vsub.f32 %v1924_v61, %v349_v58 }
  0x60   : > { %1229 = vmatprep.subr.bf16.mxu1 %v1504_v1  ;;  %1301 = vmatprep.subr.bf16.mxu0 %v1504_v1  ;;  %v367_v32 = vand.u32 4294901760, %v1946_v8  ;;  %v1239_v22 = vpack.c.bf16 %v333_v27, %v327_v16  ;;  %v1251_v0 = vpack.c.bf16 %v1744_v38, %v1714_v31  ;;  %v1269_v31 = vpack.c.bf16 %v1926_v62, %v1924_v61 }
  0x61   : > { %1059 = vmatprep.mubr.msk.f32.mxu1 %vm1505_vm0, %v1506_v4  ;;  %1164 = vmatprep.mubr.msk.f32.mxu0 %vm1505_vm0, %v1506_v4  ;;  %v339_v35 = vand.u32 4294901760, %v338_v28  ;;  %v345_v36 = vand.u32 4294901760, %v344_v29  ;;  %v1272_v33 = vpack.c.bf16 %v1946_v8, %v1944_v59 }
  0x62   : > { %v368_v40 = vsub.f32 %v1946_v8, %v367_v32  ;;  %v1320_v47 = vpack.c.bf16 %v367_v32, %v361_v30 }
  0x63   : > { %1231 = vmatpush3.bf16.msra.mxu1 %v1230_v49  ;;  %1303 = vmatpush3.bf16.msra.mxu0 %v1302_v46  ;;  %v351_v46 = vand.u32 4294901760, %v350_v17  ;;  %v1242_v48 = vpack.c.bf16 %v345_v36, %v339_v35  ;;  %v357_v49 = vand.u32 4294901760, %v356_v39 }
  0x64   : > { %1232 = vmatprep.subr.bf16.mxu1 %v1504_v1  ;;  %1304 = vmatprep.subr.bf16.mxu0 %v1504_v1  ;;  %v369_v63 = vand.u32 4294901760, %v368_v40 }
  0x65   : > { %v1245_v50 = vpack.c.bf16 %v357_v49, %v351_v46 }
  0x66   : > { %v1248_v44 = vpack.c.bf16 %v369_v63, %v363_v56 }
  0x67   : > { %1234 = vmatpush3.bf16.msra.mxu1 %v1233_v10  ;;  %1306 = vmatpush3.bf16.msra.mxu0 %v1305_v3  ;;  %v1254_v3 = vpack.c.bf16 %v1786_v52, %v1784_v51 }
  0x68   : > { %1235 = vmatprep.subr.bf16.mxu1 %v1504_v1  ;;  %1307 = vmatprep.subr.bf16.mxu0 %v1504_v1 }
  0x6b   : > { %1237 = vmatpush3.bf16.msra.mxu1 %v1236_v26  ;;  %1309 = vmatpush3.bf16.msra.mxu0 %v1308_v14 }
  0x6c   : > { %1238 = vmatprep.subr.bf16.mxu1 %v1504_v1  ;;  %1310 = vmatprep.subr.bf16.mxu0 %v1504_v1 }
  0x6f   : > { %1240 = vmatpush3.bf16.msra.mxu1 %v1239_v22  ;;  %1312 = vmatpush3.bf16.msra.mxu0 %v1311_v34 }
  0x70   : > { %1241 = vmatprep.subr.bf16.mxu1 %v1504_v1  ;;  %1313 = vmatprep.subr.bf16.mxu0 %v1504_v1 }
  0x73   : > { %1243 = vmatpush3.bf16.msra.mxu1 %v1242_v48  ;;  %1315 = vmatpush3.bf16.msra.mxu0 %v1314_v45 }
  0x74   : > { %1244 = vmatprep.subr.bf16.mxu1 %v1504_v1  ;;  %1316 = vmatprep.subr.bf16.mxu0 %v1504_v1 }
  0x77   : > { %1246 = vmatpush3.bf16.msra.mxu1 %v1245_v50  ;;  %1318 = vmatpush3.bf16.msra.mxu0 %v1317_v54 }
  0x78   : > { %1247 = vmatprep.subr.bf16.mxu1 %v1504_v1  ;;  %1319 = vmatprep.subr.bf16.mxu0 %v1504_v1 }
  0x7b   : > { %1249 = vmatpush3.bf16.msra.mxu1 %v1248_v44  ;;  %1321 = vmatpush3.bf16.msra.mxu0 %v1320_v47 }
  0x7c   : > { %1250 = vmatprep.subr.bf16.mxu1 %v1504_v1  ;;  %1322 = vmatprep.subr.bf16.mxu0 %v1504_v1 }
  0x7e   : > { %1060 = vmatmul.mubr.f32.vlgmr.msra.gmra.mrb[0].mxu1 %v1794_v53  ;;  %1165 = vmatmul.mubr.f32.vlgmr.msra.gmra.mrb[0].mxu0 %v1794_v53 }
  0x7f   : > { %1252 = vmatpush3.bf16.msra.mxu1 %v1251_v0  ;;  %1324 = vmatpush3.bf16.msk.msra.mxu0 %vm1664_vm5, %v1507_v19 }
  0x80   : > { %1253 = vmatprep.subr.bf16.mxu1 %v1504_v1  ;;  %1325 = vmatprep.subr.bf16.mxu0 %v1504_v1 }
  0x81   : > { %1094 = vmatprep.mubr.msk.f32.mxu1 %vm1505_vm0, %v1506_v4  ;;  %1199 = vmatprep.mubr.msk.f32.mxu0 %vm1505_vm0, %v1506_v4  ;;  %v1260_v4 = vpack.c.bf16 %v1852_v9, %v1839_v6 }
  0x83   : > { %1255 = vmatpush3.bf16.msra.mxu1 %v1254_v3  ;;  %1327 = vmatpush3.bf16.msk.msra.mxu0 %vm1678_vm6, %v1507_v19 }
  0x84   : > { %1256 = vmatprep.subr.bf16.mxu1 %v1504_v1  ;;  %1328 = vmatprep.subr.bf16.mxu0 %v1504_v1 }
  0x87   : > { %1258 = vmatpush3.bf16.msra.mxu1 %v1257_v18  ;;  %1330 = vmatpush3.bf16.msk.msra.mxu0 %vm1700_vm9, %v1507_v19 }
  0x88   : > { %1259 = vmatprep.subr.bf16.mxu1 %v1504_v1  ;;  %1331 = vmatprep.subr.bf16.mxu0 %v1504_v1 }
  0x8b   : > { %1261 = vmatpush3.bf16.msra.mxu1 %v1260_v4  ;;  %1333 = vmatpush3.bf16.msk.msra.mxu0 %vm1730_vm12, %v1507_v19 }
  0x8c   : > { %1262 = vmatprep.subr.bf16.mxu1 %v1504_v1  ;;  %1334 = vmatprep.subr.bf16.mxu0 %v1504_v1 }
  0x8f   : > { %1264 = vmatpush3.bf16.msra.mxu1 %v1263_v20  ;;  %1336 = vmatpush3.bf16.msk.msra.mxu0 %vm1765_vm15, %v1507_v19 }
  0x90   : > { %1265 = vmatprep.subr.bf16.mxu1 %v1504_v1  ;;  %1337 = vmatprep.subr.bf16.mxu0 %v1504_v1 }
  0x93   : > { %1267 = vmatpush3.bf16.msra.mxu1 %v1266_v24  ;;  %1339 = vmatpush3.bf16.msk.msra.mxu0 %vm1809_vm3, %v1507_v19 }
  0x94   : > { %1268 = vmatprep.subr.bf16.mxu1 %v1504_v1  ;;  %1340 = vmatprep.subr.bf16.mxu0 %v1504_v1 }
  0x97   : > { %1270 = vmatpush3.bf16.msra.mxu1 %v1269_v31  ;;  %1342 = vmatpush3.bf16.msk.msra.mxu0 %vm1847_vm8, %v1507_v19 }
  0x98   : > { %1271 = vmatprep.subr.bf16.mxu1 %v1504_v1  ;;  %1343 = vmatprep.subr.bf16.mxu0 %v1504_v1 }
  0x9b   : > { %1273 = vmatpush3.bf16.msra.mxu1 %v1272_v33  ;;  %1345 = vmatpush3.bf16.msk.msra.mxu0 %vm1879_vm13, %v1507_v19 }
  0x9e   : > { %1095 = vmatmul.mubr.f32.vlgmr.msra.gmra.mrb[0].mxu1 %v1822_v60  ;;  %1200 = vmatmul.mubr.f32.vlgmr.msra.gmra.mrb[0].mxu0 %v1794_v53 }
 0x171   : > { %v494_v38 = vpop.f32.mrb[0].mxu1  ;;  %v741_v43 = vpop.f32.mrb[0].mxu0 }
 0x172   : > { %v1346_v51 = vadd.f32 %v741_v43, %v494_v38  ;;  %v1096_v52 = vpop.f32.mrb[1].mxu1  ;;  %v1201_v1 = vpop.f32.mrb[1].mxu0 }
 0x174   : > { %745 = vst [vmem:[%s131_s25] sm:$0xff] %v1346_v51 }
 0x175   : > { %1448 = shalt.err (!%p1445_p4)
}
 0x176   : > { %s1449_s5 = scalar_lea.hbm %s2036_s29, 128  ;;  %s1453_s14 = scalar_lea.hbm %s2081_s1, 256 }
 0x177   : > { %p1450_p5 = scmp.ne.s32.totalorder %s2036_s29, %s1449_s5  ;;  %p1454_p0 = scmp.lt.u32.totalorder %s2036_s29, %s2081_s1 }
 0x178   : > { %p1455_p1 = scmp.lt.u32.totalorder %s1453_s14, %s1449_s5  ;;  %p1457_p6 = scmp.lt.u32.totalorder %s1449_s5, %s2036_s29 }
 0x179   : > { %p1451_p8 = pnand %p1450_p5, %p2106_p11 }
 0x17a   : > { %p1456_p3 = por %p1455_p1, %p1454_p0 }
 0x17b   : > { %p1452_p9 = pneg %p1451_p8 }
 0x17c   : > { %p1458_p12 = por %p1457_p6, %p1456_p3 }
 0x17e   : > { %p1459_p13 = pnand %p1458_p12, %p1452_p9 }
 0x180   : > { %1462 = shalt.err (!%p1459_p13)
}
 0x181   : > { %1357 = dma.vmem_to_hbm [thread:$0]  (%p2106_p11), %s2038_s26, 128, %s2036_s29, %s747_s10  }
 0x182 PF: > { %s772_s21 = sand.u32 1, %s1489_s6   ;;  %p2107_p7 = scmp.ne.s32.totalorder %s2086_s19, 0 }
 0x183   : > { %p2108_p10 = scmp.ge.s32.totalorder %s1501_s9, 2  ;;  %s773_s22 = scalar_lea.sflag [#allocation4], %s772_s21 }
 0x185   : > { %p1364_p2 = pnand %p2108_p10, %p2107_p7 }
 0x187   : > { %1484 = dma.done.wait (!%p1364_p2), %s773_s22, 128  }
 0x188   : > { %1486 = vsyncadd (!%p1364_p2), %s773_s22, 4294967168  ;;  %p14_p4 = scmp.ge.s32.totalorder %s1544_s12, 4   ;;  %s2109_s6 = smov %s1493_s7 }
 0x189   : > { %s2110_s7 = smov %s1497_s8  ;;  %s2111_s8 = smov %s1556_s15 }
 0x18a   : > { %s2112_s9 = smov %s1544_s12  ;;  %16 = sbr.rel (!%p14_p4) target bundleno = 5 (0x5), region = 69 }
 0x191   :  { %778 = vsyncpa [#allocation3], 1 }
 0x192   :  { %780 = vsyncpa [#allocation3 + $0x1], 1 }
 0x193   :  { %781 = vsyncpa [#allocation4], 1 }
 0x194   :  { %783 = vsyncpa [#allocation4 + $0x1], 1 }

</bundles_post_ra>
